<compile_context>
chip_gen: v7x
topology: tpu7x:2x2x1
jax: 0.10.0
libtpu: 0.0.40
codegen_flags: <defaults>
</compile_context>

<pallas_src>
import jax
import jax.numpy as jnp
from jax import lax
from jax.experimental import pallas as pl
from jax.experimental.pallas import tpu as pltpu

BN_EPS = 1e-5


def _round_up(v, m):
    return (v + m - 1) // m * m


def _pick_block_n(n, cap=32):
    """Largest divisor of n that is <= cap (samples per grid step)."""
    # TODO(synk): mask a ragged tail block instead of requiring TN | N so that
    # large prime batch sizes do not fall back to TN == 1.
    best = 1
    for d in range(1, min(n, cap) + 1):
        if n % d == 0:
            best = d
    return best


def emg_conv_block(x, weight, bias, gamma, beta, *, padding=1, block_n=None):
    """Forward of EMGConvBlock: ReLU(BatchNorm1d(Conv1d(x))) with batch statistics.

    x:      (N, C_in, L) float32, NCL layout (as in PyTorch)
    weight: (C_out, C_in, K) conv weight
    bias:   (C_out,) conv bias -- accepted for API parity; it is cancelled exactly
            by train-mode BatchNorm's per-channel mean subtraction.
    gamma, beta: (C_out,) BN affine parameters.
    Returns (N, C_out, L_out) float32 in NCL layout.
    """
    del bias  # exactly cancelled by train-mode BN's mean subtraction
    # TODO(synk): if this kernel is ever reused with eval-mode (running) statistics
    # the dropped conv bias must be re-added; it only cancels against batch stats.

    N, C_in, L = x.shape
    C_out, _, K = weight.shape
    L_in = L + 2 * padding
    L_out = L_in - K + 1
    C_in_pad = _round_up(C_in, 8)          # sublane-align the contraction chunks
    KC = K * C_in_pad
    inv_count = 1.0 / float(N * L_out)     # full-batch divisor (biased variance)

    TN = _pick_block_n(N) if block_n is None else block_n
    assert N % TN == 0, (N, TN)
    NB = N // TN

    # ---- O(params) wrapper-side packing; no pass over the activation -----------
    # weight (C_out, C_in, K) -> (C_out, K*C_in_pad); flat index = k*C_in_pad + c,
    # then replicated across the TN batch slots so the in-kernel conv is one
    # batched dot_general (weights stay resident in VMEM across the whole grid).
    w_flat = jnp.transpose(
        jnp.pad(weight, ((0, 0), (0, C_in_pad - C_in), (0, 0))), (0, 2, 1)
    ).reshape(C_out, KC).astype(jnp.float32)
    w_b = jnp.broadcast_to(w_flat[None], (TN, C_out, KC))
    gb = jnp.stack([gamma, beta]).reshape(2, C_out, 1).astype(jnp.float32)

    def kernel(x_ref, w_ref, gb_ref, o_ref, scale_ref, shift_ref):
        p = pl.program_id(0)   # 0 = statistics pass, 1 = normalize/write pass
        n = pl.program_id(1)   # sample-block index

        @pl.when(jnp.logical_and(p == 0, n == 0))
        def _init():
            scale_ref[...] = jnp.zeros_like(scale_ref)   # holds sum    during pass 0
            shift_ref[...] = jnp.zeros_like(shift_ref)   # holds sum-sq during pass 0

        # Zero-pad the raw tile in-register: halo lanes + channel sublanes -> 8.
        xr = x_ref[...]                                          # (TN, C_in, L)
        if padding:
            zl = jnp.zeros((TN, C_in, padding), jnp.float32)
            xr = jnp.concatenate([zl, xr, zl], axis=2)           # (TN, C_in, L_in)
        if C_in_pad != C_in:
            zc = jnp.zeros((TN, C_in_pad - C_in, L_in), jnp.float32)
            xr = jnp.concatenate([xr, zc], axis=1)               # (TN, C_in_pad, L_in)

        # In-VMEM im2col: K lane-shifted windows stacked along the sublane axis.
        windows = jnp.concatenate(
            [xr[:, :, k:k + L_out] for k in range(K)], axis=1)   # (TN, KC, L_out)

        # Conv1d for the whole sample block: one fused MXU contraction over KC.
        y = lax.dot_general(
            w_ref[...], windows,
            dimension_numbers=(((2,), (1,)), ((0,), (0,))),
            preferred_element_type=jnp.float32)                  # (TN, C_out, L_out)

        @pl.when(p == 0)
        def _accumulate_stats():
            # TODO(synk): switch to shifted / Welford accumulation if EMG scales
            # make E[y^2] - mean^2 cancel catastrophically in f32.
            ps = jnp.sum(y, axis=2, keepdims=True)               # (TN, C_out, 1)
            pq = jnp.sum(y * y, axis=2, keepdims=True)
            scale_ref[...] += jnp.sum(ps, axis=0, keepdims=True)
            shift_ref[...] += jnp.sum(pq, axis=0, keepdims=True)

        @pl.when(jnp.logical_and(p == 1, n == 0))
        def _fold_bn_once():
            # Hoisted out of the steady-state pass-1 loop: fold the batch stats and
            # gamma/beta into one per-channel scale/shift, overwriting the scratch.
            mean = scale_ref[...] * inv_count
            var = jnp.maximum(shift_ref[...] * inv_count - mean * mean, 0.0)
            s = gb_ref[0:1] * lax.rsqrt(var + BN_EPS)            # (1, C_out, 1)
            t = gb_ref[1:2] - mean * s
            scale_ref[...] = s
            shift_ref[...] = t

        @pl.when(p == 1)
        def _normalize_and_store():
            o_ref[...] = jnp.maximum(
                y * scale_ref[...] + shift_ref[...], 0.0).astype(o_ref.dtype)

    # VMEM budget derived from the real tile footprint; capped at 64 MiB so the
    # same number stays within v7x's physical VMEM while letting v5e/v6e exceed
    # the default scoped limit when tiles grow.
    tile_bytes = 4 * (
        2 * TN * C_in * L            # double-buffered x tiles
        + 2 * TN * C_out * L_out     # double-buffered out tiles
        + TN * C_out * KC            # resident (replicated) weights
        + 2 * C_out                  # gamma/beta
        + 2 * C_out                  # stats / scale-shift scratch
    )
    vmem_limit = int(min(max(2 * tile_bytes, 32 * 1024 * 1024), 64 * 1024 * 1024))

    out = pl.pallas_call(
        kernel,
        out_shape=jax.ShapeDtypeStruct((N, C_out, L_out), jnp.float32),
        grid=(2, NB),
        in_specs=[
            # Raw, unpadded activation tile: C_in / L block dims equal the full
            # array dims, so no wrapper-side pad of x is needed.
            pl.BlockSpec((TN, C_in, L), lambda p, n: (n, 0, 0)),
            # Flattened conv weight, resident across the whole grid.
            pl.BlockSpec((TN, C_out, KC), lambda p, n: (0, 0, 0)),
            # Packed gamma/beta, resident across the whole grid.
            pl.BlockSpec((2, C_out, 1), lambda p, n: (0, 0, 0)),
        ],
        # Pass 0 parks on output block 0 and never stores to it; only pass 1
        # writes, and block 0 is rewritten with correct values at the first
        # pass-1 step, so even an eager per-step writeback would end up correct.
        out_specs=pl.BlockSpec((TN, C_out, L_out), lambda p, n: (p * n, 0, 0)),
        scratch_shapes=[
            pltpu.VMEM((1, C_out, 1), jnp.float32),  # sum    -> BN scale after fold
            pltpu.VMEM((1, C_out, 1), jnp.float32),  # sum-sq -> BN shift after fold
        ],
        compiler_params=pltpu.CompilerParams(
            # The pass axis is a true dependency; the sample axis feeds a single
            # shared stats scratch, so both stay "arbitrary".
            # TODO(synk): on v7x megacore, shard the sample axis across the two
            # TensorCores with per-core partial stats and a tiny combine step.
            dimension_semantics=("arbitrary", "arbitrary"),
            vmem_limit_bytes=vmem_limit,
        ),
    )(x, w_b, gb)
    # TODO(synk): for very long sequences, tile L in 128-lane multiples with a
    # (K-1)-column halo so stores are lane-dense and one sample block need not
    # hold the whole sequence in VMEM.
    return out


def _reference(x, weight, bias, gamma, beta, *, padding=1):
    """Pure-JAX reference matching PyTorch Conv1d + train-mode BatchNorm1d + ReLU."""
    N, C_in, L = x.shape
    C_out, _, K = weight.shape
    x_pad = jnp.pad(x, ((0, 0), (0, 0), (padding, padding)))
    L_out = L + 2 * padding - K + 1
    cols = jnp.stack([x_pad[:, :, k:k + L_out] for k in range(K)], axis=-1)
    y = jnp.einsum('nclk,ock->nol', cols, weight) + bias[None, :, None]
    mean = jnp.mean(y, axis=(0, 2), keepdims=True)
    var = jnp.mean((y - mean) ** 2, axis=(0, 2), keepdims=True)
    y = (y - mean) / jnp.sqrt(var + BN_EPS)
    y = y * gamma[None, :, None] + beta[None, :, None]
    return jnp.maximum(y, 0.0)


if __name__ == "__main__":
    # Small shapes consistent with the module: batch=2, in_ch=4, out_ch=8, seq=16.
    N, C_in, C_out, L, K, PAD = 2, 4, 8, 16, 3, 1

    key = jax.random.PRNGKey(0)
    kx, kw, kb, kg, kbe = jax.random.split(key, 5)

    x = jax.random.normal(kx, (N, C_in, L), dtype=jnp.float32)

    # Deterministic parameter init (shapes from nn.Conv1d / nn.BatchNorm1d):
    fan_in = C_in * K
    bound = 1.0 / (fan_in ** 0.5)
    weight = jax.random.uniform(kw, (C_out, C_in, K), minval=-bound, maxval=bound,
                                dtype=jnp.float32)
    bias = jax.random.uniform(kb, (C_out,), minval=-bound, maxval=bound,
                              dtype=jnp.float32)
    gamma = 1.0 + 0.1 * jax.random.normal(kg, (C_out,), dtype=jnp.float32)
    beta = 0.1 * jax.random.normal(kbe, (C_out,), dtype=jnp.float32)

    out = emg_conv_block(x, weight, bias, gamma, beta, padding=PAD)
    out = jax.block_until_ready(out)

    ref = _reference(x, weight, bias, gamma, beta, padding=PAD)
    assert out.shape == (N, C_out, L), out.shape
    assert jnp.allclose(out, ref, atol=1e-4, rtol=1e-4), \
        float(jnp.max(jnp.abs(out - ref)))

    print("KERNEL_OK")
</pallas_src>

<mosaic_0001>
module attributes {stable_mosaic.version = 11 : i64} {
  func.func @kernel(%arg0: i32, %arg1: i32, %arg2: memref<2x4x16xf32, #tpu.memory_space<vmem>>, %arg3: memref<2x8x24xf32, #tpu.memory_space<vmem>>, %arg4: memref<2x8x1xf32, #tpu.memory_space<vmem>>, %arg5: memref<2x8x16xf32, #tpu.memory_space<vmem>>, %arg6: memref<1x8x1xf32, #tpu.memory_space<vmem>>, %arg7: memref<1x8x1xf32, #tpu.memory_space<vmem>>) attributes {dimension_semantics = [#tpu.dimension_semantics<arbitrary>, #tpu.dimension_semantics<arbitrary>], iteration_bounds = array<i64: 2, 1>, scalar_prefetch = 0 : i64, scratch_operands = 2 : i64, tpu.core_type = #tpu.core_type<tc>, window_params = [{transform_indices = @transform_0, window_bounds = array<i64: 2, 4, 16>}, {pipeline_mode = #tpu.pipeline_mode<synchronous>, transform_indices = @transform_1, window_bounds = array<i64: 2, 8, 24>}, {pipeline_mode = #tpu.pipeline_mode<synchronous>, transform_indices = @transform_2, window_bounds = array<i64: 2, 8, 1>}, {transform_indices = @transform_3, window_bounds = array<i64: 2, 8, 16>}]} {
    %c0_i32 = arith.constant 0 : i32
    %0 = arith.cmpi eq, %arg0, %c0_i32 : i32
    %c0_i32_0 = arith.constant 0 : i32
    %1 = arith.cmpi eq, %arg1, %c0_i32_0 : i32
    %2 = arith.andi %0, %1 : i1
    %3 = arith.extui %2 : i1 to i32
    %c0_i32_1 = arith.constant 0 : i32
    %4 = arith.cmpi ne, %3, %c0_i32_1 : i32
    scf.if %4 {
      %cst_15 = arith.constant 0.000000e+00 : f32
      %27 = vector.broadcast %cst_15 : f32 to vector<1x8x1xf32>
      %c0_16 = arith.constant 0 : index
      %c0_17 = arith.constant 0 : index
      %c0_18 = arith.constant 0 : index
      %28 = vector.load %arg6[%c0_16, %c0_17, %c0_18] : memref<1x8x1xf32, #tpu.memory_space<vmem>>, vector<1x8x1xf32>
      tpu.vector_store %arg6[%c0_16, %c0_17, %c0_18], %27 {strides = array<i32>} : memref<1x8x1xf32, #tpu.memory_space<vmem>>, vector<1x8x1xf32>,
      %cst_19 = arith.constant 0.000000e+00 : f32
      %29 = vector.broadcast %cst_19 : f32 to vector<1x8x1xf32>
      %c0_20 = arith.constant 0 : index
      %c0_21 = arith.constant 0 : index
      %c0_22 = arith.constant 0 : index
      %30 = vector.load %arg7[%c0_20, %c0_21, %c0_22] : memref<1x8x1xf32, #tpu.memory_space<vmem>>, vector<1x8x1xf32>
      tpu.vector_store %arg7[%c0_20, %c0_21, %c0_22], %29 {strides = array<i32>} : memref<1x8x1xf32, #tpu.memory_space<vmem>>, vector<1x8x1xf32>,
    } else {
    }
    %c0 = arith.constant 0 : index
    %c0_2 = arith.constant 0 : index
    %c0_3 = arith.constant 0 : index
    %5 = vector.load %arg2[%c0, %c0_2, %c0_3] : memref<2x4x16xf32, #tpu.memory_space<vmem>>, vector<2x4x16xf32>
    %cst = arith.constant 0.000000e+00 : f32
    %6 = vector.broadcast %cst : f32 to vector<2x4x1xf32>
    %7 = tpu.concatenate %6, %5, %6 in 2 : vector<2x4x1xf32>, vector<2x4x16xf32>, vector<2x4x1xf32> -> vector<2x4x18xf32>
    %cst_4 = arith.constant 0.000000e+00 : f32
    %8 = vector.broadcast %cst_4 : f32 to vector<2x4x18xf32>
    %9 = tpu.concatenate %7, %8 in 1 : vector<2x4x18xf32>, vector<2x4x18xf32> -> vector<2x8x18xf32>
    %10 = vector.extract_strided_slice %9 {offsets = [0, 0, 0], sizes = [2, 8, 16], strides = [1, 1, 1]} : vector<2x8x18xf32> to vector<2x8x16xf32>
    %11 = vector.extract_strided_slice %9 {offsets = [0, 0, 1], sizes = [2, 8, 16], strides = [1, 1, 1]} : vector<2x8x18xf32> to vector<2x8x16xf32>
    %12 = vector.extract_strided_slice %9 {offsets = [0, 0, 2], sizes = [2, 8, 16], strides = [1, 1, 1]} : vector<2x8x18xf32> to vector<2x8x16xf32>
    %13 = tpu.concatenate %10, %11, %12 in 1 : vector<2x8x16xf32>, vector<2x8x16xf32>, vector<2x8x16xf32> -> vector<2x24x16xf32>
    %c0_5 = arith.constant 0 : index
    %c0_6 = arith.constant 0 : index
    %c0_7 = arith.constant 0 : index
    %14 = vector.load %arg3[%c0_5, %c0_6, %c0_7] : memref<2x8x24xf32, #tpu.memory_space<vmem>>, vector<2x8x24xf32>
    %cst_8 = arith.constant dense<0.000000e+00> : vector<2x8x16xf32>
    %15 = tpu.matmul %14, %13, %cst_8 {dimension_numbers = #tpu.dot_dimension_numbers<[2], [1], [1], [2], [0, 0, 0, 1, 1, 2], [0], [0]>} : vector<2x8x24xf32>, vector<2x24x16xf32>, vector<2x8x16xf32> -> vector<2x8x16xf32>
    %c0_i32_9 = arith.constant 0 : i32
    %16 = arith.cmpi eq, %arg0, %c0_i32_9 : i32
    %17 = arith.extui %16 : i1 to i32
    %c0_i32_10 = arith.constant 0 : i32
    %18 = arith.cmpi ne, %17, %c0_i32_10 : i32
    scf.if %18 {
      %cst_15 = arith.constant dense<0.000000e+00> : vector<2x8xf32>
      %27 = vector.multi_reduction <add>, %15, %cst_15 [2] : vector<2x8x16xf32> to vector<2x8xf32>
      %28 = vector.shape_cast %27 : vector<2x8xf32> to vector<2x8x1xf32>
      %29 = arith.mulf %15, %15 : vector<2x8x16xf32>
      %cst_16 = arith.constant dense<0.000000e+00> : vector<2x8xf32>
      %30 = vector.multi_reduction <add>, %29, %cst_16 [2] : vector<2x8x16xf32> to vector<2x8xf32>
      %31 = vector.shape_cast %30 : vector<2x8xf32> to vector<2x8x1xf32>
      %c0_17 = arith.constant 0 : index
      %c0_18 = arith.constant 0 : index
      %c0_19 = arith.constant 0 : index
      %32 = vector.load %arg6[%c0_17, %c0_18, %c0_19] : memref<1x8x1xf32, #tpu.memory_space<vmem>>, vector<1x8x1xf32>
      %cst_20 = arith.constant dense<0.000000e+00> : vector<8x1xf32>
      %33 = vector.multi_reduction <add>, %28, %cst_20 [0] : vector<2x8x1xf32> to vector<8x1xf32>
      %34 = vector.shape_cast %33 : vector<8x1xf32> to vector<1x8x1xf32>
      %35 = arith.addf %32, %34 : vector<1x8x1xf32>
      %c0_21 = arith.constant 0 : index
      %c0_22 = arith.constant 0 : index
      %c0_23 = arith.constant 0 : index
      %36 = vector.load %arg6[%c0_21, %c0_22, %c0_23] : memref<1x8x1xf32, #tpu.memory_space<vmem>>, vector<1x8x1xf32>
      tpu.vector_store %arg6[%c0_21, %c0_22, %c0_23], %35 {strides = array<i32>} : memref<1x8x1xf32, #tpu.memory_space<vmem>>, vector<1x8x1xf32>,
      %c0_24 = arith.constant 0 : index
      %c0_25 = arith.constant 0 : index
      %c0_26 = arith.constant 0 : index
      %37 = vector.load %arg7[%c0_24, %c0_25, %c0_26] : memref<1x8x1xf32, #tpu.memory_space<vmem>>, vector<1x8x1xf32>
      %cst_27 = arith.constant dense<0.000000e+00> : vector<8x1xf32>
      %38 = vector.multi_reduction <add>, %31, %cst_27 [0] : vector<2x8x1xf32> to vector<8x1xf32>
      %39 = vector.shape_cast %38 : vector<8x1xf32> to vector<1x8x1xf32>
      %40 = arith.addf %37, %39 : vector<1x8x1xf32>
      %c0_28 = arith.constant 0 : index
      %c0_29 = arith.constant 0 : index
      %c0_30 = arith.constant 0 : index
      %41 = vector.load %arg7[%c0_28, %c0_29, %c0_30] : memref<1x8x1xf32, #tpu.memory_space<vmem>>, vector<1x8x1xf32>
      tpu.vector_store %arg7[%c0_28, %c0_29, %c0_30], %40 {strides = array<i32>} : memref<1x8x1xf32, #tpu.memory_space<vmem>>, vector<1x8x1xf32>,
    } else {
    }
    %c1_i32 = arith.constant 1 : i32
    %19 = arith.cmpi eq, %arg0, %c1_i32 : i32
    %c0_i32_11 = arith.constant 0 : i32
    %20 = arith.cmpi eq, %arg1, %c0_i32_11 : i32
    %21 = arith.andi %19, %20 : i1
    %22 = arith.extui %21 : i1 to i32
    %c0_i32_12 = arith.constant 0 : i32
    %23 = arith.cmpi ne, %22, %c0_i32_12 : i32
    scf.if %23 {
      %c0_15 = arith.constant 0 : index
      %c0_16 = arith.constant 0 : index
      %c0_17 = arith.constant 0 : index
      %27 = vector.load %arg6[%c0_15, %c0_16, %c0_17] : memref<1x8x1xf32, #tpu.memory_space<vmem>>, vector<1x8x1xf32>
      %cst_18 = arith.constant 3.125000e-02 : f32
      %28 = vector.broadcast %cst_18 : f32 to vector<1x8x1xf32>
      %29 = arith.mulf %27, %28 : vector<1x8x1xf32>
      %c0_19 = arith.constant 0 : index
      %c0_20 = arith.constant 0 : index
      %c0_21 = arith.constant 0 : index
      %30 = vector.load %arg7[%c0_19, %c0_20, %c0_21] : memref<1x8x1xf32, #tpu.memory_space<vmem>>, vector<1x8x1xf32>
      %cst_22 = arith.constant 3.125000e-02 : f32
      %31 = vector.broadcast %cst_22 : f32 to vector<1x8x1xf32>
      %32 = arith.mulf %30, %31 : vector<1x8x1xf32>
      %33 = arith.mulf %29, %29 : vector<1x8x1xf32>
      %34 = arith.subf %32, %33 : vector<1x8x1xf32>
      %cst_23 = arith.constant 0.000000e+00 : f32
      %35 = vector.broadcast %cst_23 : f32 to vector<1x8x1xf32>
      %36 = arith.maximumf %34, %35 : vector<1x8x1xf32>
      %c0_24 = arith.constant 0 : index
      %c0_25 = arith.constant 0 : index
      %c0_26 = arith.constant 0 : index
      %37 = vector.load %arg4[%c0_24, %c0_25, %c0_26] : memref<2x8x1xf32, #tpu.memory_space<vmem>>, vector<1x8x1xf32>
      %cst_27 = arith.constant 9.99999974E-6 : f32
      %38 = vector.broadcast %cst_27 : f32 to vector<1x8x1xf32>
      %39 = arith.addf %36, %38 : vector<1x8x1xf32>
      %40 = math.rsqrt %39 : vector<1x8x1xf32>
      %41 = arith.mulf %37, %40 : vector<1x8x1xf32>
      %c1 = arith.constant 1 : index
      %c0_28 = arith.constant 0 : index
      %c0_29 = arith.constant 0 : index
      %42 = vector.load %arg4[%c1, %c0_28, %c0_29] : memref<2x8x1xf32, #tpu.memory_space<vmem>>, vector<1x8x1xf32>
      %43 = arith.mulf %29, %41 : vector<1x8x1xf32>
      %44 = arith.subf %42, %43 : vector<1x8x1xf32>
      %c0_30 = arith.constant 0 : index
      %c0_31 = arith.constant 0 : index
      %c0_32 = arith.constant 0 : index
      %45 = vector.load %arg6[%c0_30, %c0_31, %c0_32] : memref<1x8x1xf32, #tpu.memory_space<vmem>>, vector<1x8x1xf32>
      tpu.vector_store %arg6[%c0_30, %c0_31, %c0_32], %41 {strides = array<i32>} : memref<1x8x1xf32, #tpu.memory_space<vmem>>, vector<1x8x1xf32>,
      %c0_33 = arith.constant 0 : index
      %c0_34 = arith.constant 0 : index
      %c0_35 = arith.constant 0 : index
      %46 = vector.load %arg7[%c0_33, %c0_34, %c0_35] : memref<1x8x1xf32, #tpu.memory_space<vmem>>, vector<1x8x1xf32>
      tpu.vector_store %arg7[%c0_33, %c0_34, %c0_35], %44 {strides = array<i32>} : memref<1x8x1xf32, #tpu.memory_space<vmem>>, vector<1x8x1xf32>,
    } else {
    }
    %c1_i32_13 = arith.constant 1 : i32
    %24 = arith.cmpi eq, %arg0, %c1_i32_13 : i32
    %25 = arith.extui %24 : i1 to i32
    %c0_i32_14 = arith.constant 0 : i32
    %26 = arith.cmpi ne, %25, %c0_i32_14 : i32
    scf.if %26 {
      %c0_15 = arith.constant 0 : index
      %c0_16 = arith.constant 0 : index
      %c0_17 = arith.constant 0 : index
      %27 = vector.load %arg6[%c0_15, %c0_16, %c0_17] : memref<1x8x1xf32, #tpu.memory_space<vmem>>, vector<1x8x1xf32>
      %28 = vector.broadcast %27 : vector<1x8x1xf32> to vector<2x8x16xf32>
      %29 = arith.mulf %15, %28 : vector<2x8x16xf32>
      %c0_18 = arith.constant 0 : index
      %c0_19 = arith.constant 0 : index
      %c0_20 = arith.constant 0 : index
      %30 = vector.load %arg7[%c0_18, %c0_19, %c0_20] : memref<1x8x1xf32, #tpu.memory_space<vmem>>, vector<1x8x1xf32>
      %31 = vector.broadcast %30 : vector<1x8x1xf32> to vector<2x8x16xf32>
      %32 = arith.addf %29, %31 : vector<2x8x16xf32>
      %cst_21 = arith.constant 0.000000e+00 : f32
      %33 = vector.broadcast %cst_21 : f32 to vector<2x8x16xf32>
      %34 = arith.maximumf %32, %33 : vector<2x8x16xf32>
      %c0_22 = arith.constant 0 : index
      %c0_23 = arith.constant 0 : index
      %c0_24 = arith.constant 0 : index
      %35 = vector.load %arg5[%c0_22, %c0_23, %c0_24] : memref<2x8x16xf32, #tpu.memory_space<vmem>>, vector<2x8x16xf32>
      tpu.vector_store %arg5[%c0_22, %c0_23, %c0_24], %34 {strides = array<i32>} : memref<2x8x16xf32, #tpu.memory_space<vmem>>, vector<2x8x16xf32>,
    } else {
    }
    return
  }
  func.func @transform_0(%arg0: i32, %arg1: i32) -> (i32, i32, i32) {
    %c0_i32 = arith.constant 0 : i32
    %c0_i32_0 = arith.constant 0 : i32
    %c0_i32_1 = arith.constant 0 : i32
    return %arg1, %c0_i32, %c0_i32_0 : i32, i32, i32
  }
  func.func @transform_1(%arg0: i32, %arg1: i32) -> (i32, i32, i32) {
    %c0_i32 = arith.constant 0 : i32
    %c0_i32_0 = arith.constant 0 : i32
    %c0_i32_1 = arith.constant 0 : i32
    %c0_i32_2 = arith.constant 0 : i32
    return %c0_i32, %c0_i32_0, %c0_i32_1 : i32, i32, i32
  }
  func.func @transform_2(%arg0: i32, %arg1: i32) -> (i32, i32, i32) {
    %c0_i32 = arith.constant 0 : i32
    %c0_i32_0 = arith.constant 0 : i32
    %c0_i32_1 = arith.constant 0 : i32
    %c0_i32_2 = arith.constant 0 : i32
    return %c0_i32, %c0_i32_0, %c0_i32_1 : i32, i32, i32
  }
  func.func @transform_3(%arg0: i32, %arg1: i32) -> (i32, i32, i32) {
    %0 = arith.muli %arg0, %arg1 : i32
    %c0_i32 = arith.constant 0 : i32
    %c0_i32_0 = arith.constant 0 : i32
    %c0_i32_1 = arith.constant 0 : i32
    return %0, %c0_i32, %c0_i32_0 : i32, i32, i32
  }
}

</mosaic_0001>

<bundles_post_ra>
// kernel: tpu_custom_call.1
= control target key start
LH: loop header
LB: loop body
LE: loop exit
PB: predicated region body
PF: predicated region fallthrough
CT: control target
= control target key end

     0   :  { %8 = vsyncpa [#allocation5], 0  ;;  %s906_s0 = inlined_call_operand.hbm [shape: f32[2,4,16], index: 0, kind: input, shape index: {}]   ;;  %s907_s1 = inlined_call_operand.vmem [shape: f32[2,8,24], index: 1, kind: input, shape index: {}]   ;;  %s908_s2 = inlined_call_operand.vmem [shape: f32[2,8,1], index: 2, kind: input, shape index: {}]   ;;  %s909_s3 = inlined_call_operand.hbm [shape: f32[2,8,16], index: 3, kind: output, shape index: {}]  }
   0x1   :  { %9 = vsyncpa [#allocation6], 0 }
   0x2   :  { %11 = vsyncpa [#allocation6 + $0x1], 0  ;;  %s783_s12 = smov 0   ;;  %s785_s13 = smov 0  }
   0x3   :  { %s787_s14 = smov 0  }
   0x4 LB: > { %s539_s15 = sadd.s32 4294967295, %s746_s14   ;;  %s540_s16 = sadd.s32 4294967294, %s746_s14   ;;  %s746_s14 = sphi %s787_s14, %s17_s14   ;;  %s742_s13 = sphi %s785_s13, %s920_s13   ;;  %s738_s12 = sphi %s783_s12, %s919_s12  }
   0x5   : > { %s29_s17 = sadd.s32 1, %s742_s13  ;;  %p541_p0 = scmp.ge.s32.totalorder %s746_s14, 1 }
   0x6   : > { %p31_p1 = scmp.ge.s32.totalorder %s29_s17, 2  ;;  %p130_p2 = scmp.lt.s32.totalorder %s746_s14, 3 }
   0x7   : > { %p805_p3 = scmp.eq.s32.totalorder %s539_s15, 0  ;;  %s748_s20 = smov [#allocation4]  }
   0x8   : > { %s922_s17 = smov (%p31_p1, %s29_s17), 0  ;;  %p811_p4 = pnand %p541_p0, %p130_p2 }
   0x9   : > { %s913_s18 = scalar_select %p805_p3, 1, 0 }
   0xa   : > { %s914_s19 = scalar_select %p811_p4, 1, 0 }
   0xb   : > { %s145_s21 = sshll.u32 %s748_s20, 4  ;;  %p602_p5 = pneg %p811_p4  ;;  %s146_s21 = int_to_ptr.vmem [resolvable:$true] %s145_s21 }
   0xc   : > { %s662_s25 = scalar_lea.hbm %s906_s0, 128 }
   0xd   : > { %p819_p6 = pnand %p805_p3, %p602_p5  ;;  %p663_p7 = scmp.ne.s32.totalorder %s906_s0, %s662_s25 }
   0xe   : > { %p669_p11 = scmp.lt.u32.totalorder %s662_s25, %s906_s0 }
   0xf   : > { %p664_p8 = pneg %p819_p6 }
  0x11   : > { %p665_p9 = pnand %p664_p8, %p663_p7 }
  0x13   : > { %p666_p10 = pneg %p665_p9 }
  0x15   : > { %p671_p12 = pnand %p669_p11, %p666_p10 }
  0x17   : > { %674 = shalt.err (!%p671_p12)
}
  0x18   : > { %s675_s30 = scalar_lea.vmem %s146_s21, 128  ;;  %p683_p2 = scmp.lt.s32.totalorder %s146_s21, %s146_s21 }
  0x19   : > { %p676_p13 = scmp.ne.s32.totalorder %s146_s21, %s675_s30  ;;  %p684_p5 = scmp.lt.s32.totalorder %s675_s30, %s675_s30 }
  0x1b   : > { %p678_p0 = pnand %p676_p13, %p664_p8  ;;  %p685_p3 = por %p684_p5, %p683_p2 }
  0x1d   : > { %p679_p1 = pneg %p678_p0 }
  0x1f   : > { %p686_p4 = pnand %p685_p3, %p679_p1 }
  0x21   : > { %689 = shalt.err (!%p686_p4)
}
  0x22   : > { %s749_s4 = smov 64   ;;  %s750_s5 = smov 4  }
  0x23   : > { %605 = dma.hbm_to_vmem [thread:$0]  (!%p819_p6), %s906_s0, 128, %s146_s21, [#allocation5], %s749_s4, %s749_s4, %s750_s5  }
  0x24   : > { %p916_p7 = scmp.ne.s32.totalorder %s914_s19, 0 }
  0x25   : > { %p917_p9 = scmp.ne.s32.totalorder (!%p916_p7), %s913_s18, 0 }
  0x26   : > { %167 = sbr.rel (%p916_p7) target bundleno = 867 (0x363), region = 32 }
  0x2d   : > { %729 = dma.done.wait (%p917_p9), [#allocation5], 128  }
  0x2e   : > { %731 = vsyncadd (%p917_p9), [#allocation5], 4294967168  ;;  %p189_p3 = scmp.eq.s32.totalorder %s738_s12, 0 }
  0x2f   : > { %vm195_vm0 = vcmask (%p189_p3), 7168   ;;  %v751_v0 = vmov (%p189_p3), 0.0  }
  0x30   : > { %194 = sbr.rel (!%p189_p3) target bundleno = 55 (0x37), region = 40  ;;  %196 = vst.msk [vmem:[#allocation2] sm:$0xff] (%p189_p3), %vm195_vm0, %v751_v0  ;;  %197 = vst.msk [vmem:[#allocation3] sm:$0xff] (%p189_p3), %vm195_vm0, %v751_v0 }
  0x37 PF: > { %v198_v1 = vld [vmem:[#allocation4] sm:$0xf]  ;;  %s752_s8 = smov 1   ;;  %v199_v2 = vld [vmem:[#allocation4 + $0x4] sm:$0xf]  ;;  %vm208_vm1 = vcmask 7168  }
  0x38   : > { %202 = vrot.lane.b32.xlu0 %v198_v1, %s752_s8  ;;  %v753_v4 = vmov 0.0|0.0   ;;  %vm211_vm2 = vcmask 138240   ;;  %vm214_vm3 = vcmask 1043456   ;;  %vm754_vm4 = vmmov 0   ;;  %s756_s9 = smov 126   ;;  %s757_s10 = smov 127  }
  0x39   : > { %586 = vmatprep.subr.bf16.mxu0 %v753_v4  ;;  %590 = vmatprep.subr.bf16.mxu1 %v753_v4  ;;  %v755_v9 = vmov 0.0   ;;  %vm758_vm5 = vmmov 1   ;;  %v231_v19 = vld [vmem:[%s907_s1] sm:$0xff]  ;;  %vm233_vm7 = vcmask 195584   ;;  %v232_v20 = vld [vmem:[%s907_s1 + $0x8] sm:$0xff]  ;;  %p550_p4 = scmp.ne.s32.totalorder %s738_s12, 0 }
  0x3a   : > { %574 = vmatprep.mubr.msk.f32.mxu0 %vm754_vm4, %v755_v9  ;;  %583 = vmatprep.mubr.msk.f32.mxu1 %vm754_vm4, %v755_v9  ;;  %vm588_vm6 = vmpackc.low %vm758_vm5, %vm214_vm3  ;;  %vm383_vm8 = vcmask (!%p550_p4), 130048   ;;  %v398_v35 = vld [vmem:[#allocation2] sm:$0xff] (!%p550_p4)  ;;  %v402_v38 = vld [vmem:[#allocation3] sm:$0xff] (!%p550_p4) }
  0x3c   : > { %204 = vrot.lane.b32.xlu0 %v199_v2, %s752_s8 }
  0xaa   : > { %v203_v3 = vpop.permute.xlu0 %202 }
  0xab   : > { %v209_v5 = vsel %vm208_vm1, 0.0, %v203_v3 }
  0xac   : > { %v212_v6 = vsel %vm211_vm2, %v209_v5, 0.0 }
  0xad   : > { %v215_v12 = vsel %vm214_vm3, %v212_v6, 0.0 }
  0xae   : > { %v205_v7 = vpop.permute.xlu0 %204 }
  0xaf   : > { %v210_v8 = vsel %vm208_vm1, 0.0, %v205_v7 }
  0xb0   : > { %v213_v10 = vsel %vm211_vm2, %v210_v8, 0.0 }
  0xb1   : > { %v216_v11 = vsel %vm214_vm3, %v213_v10, 0.0 }
  0xb2   : > { %227 = vrot.lane.b32.xlu0 %v216_v11, %s756_s9  ;;  %v654_v13 = vpack.i.bf16 %v216_v11, %v215_v12 }
  0xb4   : > { %655 = vrot.lane.b32.xlu1 %v654_v13, %s757_s10 }
  0xb8   : > { %225 = vrot.lane.b32.xlu1 %v215_v12, %s756_s9 }
 0x124   : > { %v228_v21 = vpop.permute.xlu0 %227 }
 0x126   : > { %v656_v14 = vpop.permute.xlu1 %655 }
 0x127   : > { %v658_v15 = vunpack.i.h.bf16 %v656_v14  ;;  %v657_v16 = vunpack.i.l.bf16 %v656_v14 }
 0x129   : > { %v591_v17 = vpack.c.bf16 %v658_v15, %v213_v10  ;;  %v587_v18 = vpack.c.bf16 %v657_v16, %v212_v6 }
 0x12a   : > { %v226_v22 = vpop.permute.xlu1 %225 }
 0x12b   : > { %589 = vmatpush3.bf16.msk.msra.mxu0 %vm588_vm6, %v587_v18  ;;  %593 = vmatpush3.bf16.msk.msra.mxu1 %vm588_vm6, %v591_v17 }
 0x12c   : > { %572 = vmatprep.subr.mxu0 %v755_v9  ;;  %581 = vmatprep.subr.mxu1 %v755_v9 }
 0x12f   : > { %573 = vmatpush3.msra.mxu0 %v226_v22  ;;  %582 = vmatpush3.msra.mxu1 %v228_v21 }
 0x130   : > { %575 = vmatmul.mubr.msk.f32.vlgmr.msra.gmra.mrb[0].mxu0 %vm233_vm7, %v231_v19  ;;  %584 = vmatmul.mubr.msk.f32.vlgmr.msra.gmra.mrb[0].mxu1 %vm233_vm7, %v232_v20 }
 0x1fe   : > { %382 = sbr.rel (%p550_p4) target bundleno = 670 (0x29e), region = 44 }
 0x203   : > { %v303_v23 = vpop.f32.mrb[0].mxu0  ;;  %v376_v24 = vpop.f32.mrb[0].mxu1 }
 0x204   : > { %v576_v25 = vpop.f32.mrb[1].mxu0  ;;  %v585_v26 = vpop.f32.mrb[1].mxu1  ;;  %v390_v27 = vmul.f32 (!%p550_p4), %v303_v23, %v303_v23  ;;  %v391_v28 = vmul.f32 (!%p550_p4), %v376_v24, %v376_v24  ;;  %v384_v29 = vsel (!%p550_p4), %vm383_vm8, %v303_v23, 0.0  ;;  %v387_v31 = vsel (!%p550_p4), %vm383_vm8, %v376_v24, 0.0 }
 0x205   : > { %385 = vadd.xlane.f32.xlu0 %v384_v29 }
 0x206   : > { %v392_v30 = vsel %vm383_vm8, %v390_v27, 0.0  ;;  %v395_v32 = vsel %vm383_vm8, %v391_v28, 0.0 }
 0x207   : > { %393 = vadd.xlane.f32.xlu1 %v392_v30 }
 0x209   : > { %388 = vadd.xlane.f32.xlu0 %v387_v31 }
 0x20b   : > { %396 = vadd.xlane.f32.xlu1 %v395_v32 }
 0x292   : > { %v386_v33 = vpop.xlane.xlu0 %385 }
 0x294   : > { %v394_v34 = vpop.xlane.xlu1 %393 }
 0x296   : > { %v389_v36 = vpop.xlane.xlu0 %388 }
 0x297   : > { %v399_v37 = vadd.f32 %v389_v36, %v386_v33 }
 0x298   : > { %v397_v39 = vpop.xlane.xlu1 %396 }
 0x299   : > { %v403_v40 = vadd.f32 %v397_v39, %v394_v34  ;;  %v400_v41 = vadd.f32 %v399_v37, %v398_v35 }
 0x29b   : > { %v404_v42 = vadd.f32 %v403_v40, %v402_v38  ;;  %401 = vst.msk [vmem:[#allocation2] sm:$0xff] %vm208_vm1, %v400_v41 }
 0x29d   : > { %405 = vst.msk [vmem:[#allocation3] sm:$0xff] %vm208_vm1, %v404_v42 }
 0x29e PF: > { %p406_p6 = scmp.eq.s32.totalorder %s738_s12, 1 }
 0x29f   : > { %v418_v51 = vld [vmem:[%s908_s2] sm:$0xff] (%p406_p6)  ;;  %v552_v54 = vld [vmem:[%s908_s2 + $0x8] sm:$0xff] (%p406_p6) }
 0x2a0   : > { %410 = sbr.rel (!%p406_p6) target bundleno = 703 (0x2bf), region = 48 }
 0x2a2   : > { %v411_v43 = vld [vmem:[#allocation2] sm:$0xff] (%p406_p6) }
 0x2a3   : > { %v412_v45 = vmul.f32 (%p406_p6), 0.03125, %v411_v43 }
 0x2a4   : > { %v413_v44 = vld [vmem:[#allocation3] sm:$0xff] (%p406_p6) }
 0x2a5   : > { %v414_v46 = vmul.f32 (%p406_p6), 0.03125, %v413_v44  ;;  %v415_v47 = vmul.f32 (%p406_p6), %v412_v45, %v412_v45 }
 0x2a7   : > { %v416_v48 = vsub.f32 %v414_v46, %v415_v47 }
 0x2a9   : > { %v417_v49 = vmax.f32 %v416_v48, 0.0 }
 0x2ab   : > { %v419_v50 = vadd.f32 1e-05, %v417_v49 }
 0x2ad   : > { %659 = vrsqrt.f32 %v419_v50 }
 0x2b7   : > { %v660_v52 = vpop.eup %659 }
 0x2b8   : > { %v421_v53 = vmul.f32 %v660_v52, %v418_v51 }
 0x2ba   : > { %426 = vst.msk [vmem:[#allocation2] sm:$0xff] %vm208_vm1, %v421_v53  ;;  %v424_v55 = vmul.f32 %v421_v53, %v412_v45 }
 0x2bc   : > { %v425_v56 = vsub.f32 %v552_v54, %v424_v55 }
 0x2be   : > { %427 = vst.msk [vmem:[#allocation3] sm:$0xff] %vm208_vm1, %v425_v56 }
 0x2bf PF: > { %p553_p8 = scmp.ne.s32.totalorder %s738_s12, 1 }
 0x2c0   : > { %v759_v58 = vmov (!%p553_p8), 0   ;;  %vm449_vm9 = vcmask (!%p553_p8), 130048  }
 0x2c1   : > { %430 = sbr.rel (%p553_p8) target bundleno = 843 (0x34b), region = 52  ;;  %v431_v57 = vld [vmem:[#allocation2] sm:$0xff] (!%p553_p8)  ;;  %661 = vset.pattern.permute.xlu0 (!%p553_p8), %v759_v58 }
 0x2c2   : > { %434 = vperm.xlu0 (!%p553_p8), %661, %v431_v57  }
 0x2c5   : > { %v439_v59 = vld [vmem:[#allocation3] sm:$0xff] (!%p553_p8) }
 0x2c6   : > { %442 = vperm.xlu0 (!%p553_p8), %661, %v439_v59  }
 0x341   : > { %v435_v60 = vpop.permute.xlu0 %434 }
 0x342   : > { %v437_v61 = vmul.f32 %v435_v60, %v303_v23  ;;  %v438_v62 = vmul.f32 %v435_v60, %v376_v24 }
 0x345   : > { %v443_v63 = vpop.permute.xlu0 %442 }
 0x346   : > { %v445_v0 = vadd.f32 %v443_v63, %v437_v61  ;;  %v446_v1 = vadd.f32 %v443_v63, %v438_v62 }
 0x348   : > { %v447_v2 = vmax.f32 %v445_v0, 0.0  ;;  %v448_v3 = vmax.f32 %v446_v1, 0.0 }
 0x34a   : > { %450 = vst.msk [vmem:[#allocation7] sm:$0xff] %vm449_vm9, %v447_v2  ;;  %451 = vst.msk [vmem:[#allocation7 + $0x8] sm:$0xff] %vm449_vm9, %v448_v3 }
 0x34b PF: > { %p872_p10 = scmp.eq.s32.totalorder %s539_s15, 1  ;;  %s760_s25 = smov [#allocation7]  }
 0x34c   : > { %s467_s26 = sshll.u32 %s760_s25, 4  ;;  %s468_s26 = int_to_ptr.vmem [resolvable:$true] %s467_s26 }
 0x34d   : > { %s690_s27 = scalar_lea.vmem %s468_s26, 256  ;;  %s696_s28 = scalar_lea.vmem %s468_s26, 512 }
 0x34e   : > { %p691_p11 = scmp.ne.s32.totalorder %s468_s26, %s690_s27  ;;  %p697_p0 = scmp.lt.s32.totalorder %s468_s26, %s468_s26 }
 0x34f   : > { %p698_p1 = scmp.lt.s32.totalorder %s696_s28, %s690_s27 }
 0x350   : > { %p692_p12 = pnand %p691_p11, %p872_p10 }
 0x351   : > { %p699_p2 = por %p698_p1, %p697_p0 }
 0x352   : > { %p693_p13 = pneg %p692_p12 }
 0x354   : > { %p700_p5 = pnand %p699_p2, %p693_p13 }
 0x356   : > { %703 = shalt.err (!%p700_p5)
}
 0x357   : > { %s704_s30 = scalar_lea.hbm %s909_s3, 256 }
 0x358   : > { %p705_p7 = scmp.ne.s32.totalorder %s909_s3, %s704_s30  ;;  %p710_p4 = scmp.lt.u32.totalorder %s704_s30, %s909_s3 }
 0x35a   : > { %p706_p9 = pnand %p705_p7, %p872_p10 }
 0x35c   : > { %p707_p3 = pneg %p706_p9 }
 0x35e   : > { %p712_p6 = pnand %p710_p4, %p707_p3 }
 0x360   : > { %715 = shalt.err (!%p712_p6)
}
 0x361   : > { %s761_s8 = smov 128   ;;  %s762_s9 = smov 8  }
 0x362   : > { %599 = dma.vmem_to_hbm [thread:$0]  (%p872_p10), %s468_s26, 256, %s909_s3, [#allocation6], %s761_s8, %s761_s8, %s762_s9  }
 0x363 PF: > { %p613_p8 = scmp.ge.s32.totalorder %s746_s14, 2  ;;  %p614_p11 = scmp.eq.s32.totalorder %s540_s16, 1 }
 0x365   : > { %p607_p12 = pnand %p614_p11, %p613_p8 }
 0x367   : > { %733 = dma.done.wait (!%p607_p12), [#allocation6], 256  }
 0x368   : > { %735 = vsyncadd (!%p607_p12), [#allocation6], 4294967040  ;;  %s17_s14 = sadd.s32 1, %s746_s14   ;;  %s919_s12 = smov %s742_s13 }
 0x369   : > { %p14_p13 = scmp.ge.s32.totalorder %s17_s14, 4   ;;  %s920_s13 = smov %s922_s17 }
 0x36b   :  { %16 = sbr.rel (!%p14_p13) target bundleno = 4 (0x4), region = 87 }
 0x372   :  { %488 = vsyncpa [#allocation5], 1 }
 0x373   :  { %490 = vsyncpa [#allocation5 + $0x1], 1 }
 0x374   :  { %491 = vsyncpa [#allocation6], 1 }
 0x375   :  { %493 = vsyncpa [#allocation6 + $0x1], 1 }

</bundles_post_ra>
